<compile_context>
chip_gen: v7x
topology: tpu7x:2x2x1
jax: 0.10.0
libtpu: 0.0.40
codegen_flags: <defaults>
</compile_context>

<pallas_src>
import functools

import jax
import jax.numpy as jnp
from jax.experimental import pallas as pl
from jax.experimental.pallas import tpu as pltpu

# ----------------------------------------------------------------------------
# Sub-loss element-wise terms (mean reduction is performed once, in-kernel,
# via the shared accumulator with 1/N folded into the per-loss scale).
# ----------------------------------------------------------------------------
def _mse_elem(x, t):
    d = x - t
    return d * d


def _l1_elem(x, t):
    return jnp.abs(x - t)


def _bce_with_logits_elem(x, t):
    # Numerically stable BCE-with-logits (same formula PyTorch uses):
    #   max(x, 0) - x*t + log(1 + exp(-|x|))
    # exp + log1p are EUP pushes (own VLIW slot) -> effectively free next to
    # the VPU work; keep this form (no sigmoid rewrite).
    return jnp.maximum(x, 0.0) - x * t + jnp.log1p(jnp.exp(-jnp.abs(x)))


LOSS_ELEM_FNS = (_mse_elem, _l1_elem, _bce_with_logits_elem)
WEIGHTS = (1.0, 0.5, 2.0)
NUM_LOSSES = len(LOSS_ELEM_FNS)


# ----------------------------------------------------------------------------
# Pallas kernel: grid over row-tiles of the (L, m, 128) slabs; one persistent
# f32 vector accumulator in VMEM scratch; single cross-lane reduce at the end.
# ----------------------------------------------------------------------------
def merged_loss_kernel(logits_ref, targets_ref, out_ref, acc_ref, *, scales):
    step = pl.program_id(0)

    @pl.when(step == 0)
    def _():
        acc_ref[...] = jnp.zeros_like(acc_ref)

    acc = acc_ref[...]
    for i in range(NUM_LOSSES):
        # In-kernel upcast only: inputs DMA'd at native dtype.
        x = logits_ref[i].astype(jnp.float32)   # (tm, 128)
        t = targets_ref[i].astype(jnp.float32)
        # scales[i] = weight_i / n_per_loss  (mean folded into the weight).
        acc = acc + jnp.float32(scales[i]) * LOSS_ELEM_FNS[i](x, t)
    acc_ref[...] = acc

    @pl.when(step == pl.num_programs(0) - 1)
    def _():
        out_ref[0, 0] = jnp.sum(acc_ref[...])


def _choose_tile_rows(m):
    """Largest row-tile <= 512 that evenly divides m (keeps (8,128) layout
    rules and, with 2 inputs x 2 pipeline buffers, stays far below v7x's
    64 MiB VMEM). Falls back to a single full block if nothing divides."""
    if m <= 512:
        return m
    for tm in (512, 256, 128, 64, 32, 16, 8):
        if m % tm == 0:
            return tm
    return m


@jax.jit
def merged_loss(logits, targets):
    """logits/targets: (L, B, C, H, W), any float dtype. Returns scalar f32."""
    L = logits.shape[0]
    assert L == NUM_LOSSES
    n_per_loss = 1
    for d in logits.shape[1:]:
        n_per_loss *= d
    assert n_per_loss % 128 == 0, "per-loss element count must be lane-divisible"
    m = n_per_loss // 128

    # Reshape only (free view) -- no dtype cast here.
    logits3 = logits.reshape(L, m, 128)
    targets3 = targets.reshape(L, m, 128)

    tm = _choose_tile_rows(m)
    n_steps = m // tm
    scales = tuple(float(w) / float(n_per_loss) for w in WEIGHTS)

    kernel = functools.partial(merged_loss_kernel, scales=scales)

    out = pl.pallas_call(
        kernel,
        out_shape=jax.ShapeDtypeStruct((1, 1), jnp.float32),
        grid=(n_steps,),
        in_specs=[
            pl.BlockSpec((L, tm, 128), lambda i: (0, i, 0)),
            pl.BlockSpec((L, tm, 128), lambda i: (0, i, 0)),
        ],
        out_specs=pl.BlockSpec((1, 1), lambda i: (0, 0),
                               memory_space=pltpu.SMEM),
        scratch_shapes=[pltpu.VMEM((tm, 128), jnp.float32)],
        compiler_params=pltpu.CompilerParams(
            dimension_semantics=("arbitrary",),
        ),
    )(logits3, targets3)
    return out[0, 0]


# ----------------------------------------------------------------------------
# Pure-JAX reference (mirrors the PyTorch forward exactly).
# ----------------------------------------------------------------------------
def merged_loss_ref(logits, targets):
    vals = []
    for i, (w, fn) in enumerate(zip(WEIGHTS, LOSS_ELEM_FNS)):
        x = logits[i].astype(jnp.float32).reshape(-1)
        t = targets[i].astype(jnp.float32).reshape(-1)
        vals.append(w * jnp.mean(fn(x, t)))
    return jnp.sum(jnp.stack(vals))


if __name__ == "__main__":
    key = jax.random.PRNGKey(0)
    k1, k2 = jax.random.split(key)

    L, B, C, H, W = NUM_LOSSES, 2, 4, 16, 16
    logits = jax.random.normal(k1, (L, B, C, H, W), dtype=jnp.float32)
    # targets in [0, 1] so the BCE slice is well-defined.
    targets = jax.random.uniform(k2, (L, B, C, H, W), dtype=jnp.float32)

    out = merged_loss(logits, targets)
    out = jax.block_until_ready(out)

    ref = merged_loss_ref(logits, targets)
    assert jnp.allclose(out, ref, rtol=1e-5, atol=1e-5), (out, ref)

    print("KERNEL_OK")
</pallas_src>

<mosaic_0001>
module attributes {stable_mosaic.version = 11 : i64} {
  func.func @merged_loss_kernel(%arg0: i32, %arg1: memref<3x16x128xf32, #tpu.memory_space<vmem>>, %arg2: memref<3x16x128xf32, #tpu.memory_space<vmem>>, %arg3: memref<1x1xf32, #tpu.memory_space<smem>>, %arg4: memref<16x128xf32, #tpu.memory_space<vmem>>) attributes {dimension_semantics = [#tpu.dimension_semantics<arbitrary>], iteration_bounds = array<i64: 1>, scalar_prefetch = 0 : i64, scratch_operands = 1 : i64, tpu.core_type = #tpu.core_type<tc>, window_params = [{transform_indices = @transform_0, window_bounds = array<i64: 3, 16, 128>}, {transform_indices = @transform_1, window_bounds = array<i64: 3, 16, 128>}, {transform_indices = @transform_2, window_bounds = array<i64: 1, 1>}]} {
    %c0_i32 = arith.constant 0 : i32
    %0 = arith.cmpi eq, %arg0, %c0_i32 : i32
    %1 = arith.extui %0 : i1 to i32
    %c0_i32_0 = arith.constant 0 : i32
    %2 = arith.cmpi ne, %1, %c0_i32_0 : i32
    scf.if %2 {
      %cst_26 = arith.constant 0.000000e+00 : f32
      %43 = vector.broadcast %cst_26 : f32 to vector<16x128xf32>
      %c0_27 = arith.constant 0 : index
      %c0_28 = arith.constant 0 : index
      %44 = vector.load %arg4[%c0_27, %c0_28] : memref<16x128xf32, #tpu.memory_space<vmem>>, vector<16x128xf32>
      tpu.vector_store %arg4[%c0_27, %c0_28], %43 {strides = array<i32>} : memref<16x128xf32, #tpu.memory_space<vmem>>, vector<16x128xf32>,
    } else {
    }
    %c0 = arith.constant 0 : index
    %c0_1 = arith.constant 0 : index
    %3 = vector.load %arg4[%c0, %c0_1] : memref<16x128xf32, #tpu.memory_space<vmem>>, vector<16x128xf32>
    %c0_2 = arith.constant 0 : index
    %c0_3 = arith.constant 0 : index
    %c0_4 = arith.constant 0 : index
    %4 = vector.load %arg1[%c0_2, %c0_3, %c0_4] : memref<3x16x128xf32, #tpu.memory_space<vmem>>, vector<1x16x128xf32>
    %5 = vector.shape_cast %4 : vector<1x16x128xf32> to vector<16x128xf32>
    %c0_5 = arith.constant 0 : index
    %c0_6 = arith.constant 0 : index
    %c0_7 = arith.constant 0 : index
    %6 = vector.load %arg2[%c0_5, %c0_6, %c0_7] : memref<3x16x128xf32, #tpu.memory_space<vmem>>, vector<1x16x128xf32>
    %7 = vector.shape_cast %6 : vector<1x16x128xf32> to vector<16x128xf32>
    %8 = arith.subf %5, %7 : vector<16x128xf32>
    %9 = arith.mulf %8, %8 : vector<16x128xf32>
    %cst = arith.constant 4.8828125E-4 : f32
    %10 = vector.broadcast %cst : f32 to vector<16x128xf32>
    %11 = arith.mulf %10, %9 : vector<16x128xf32>
    %12 = arith.addf %3, %11 : vector<16x128xf32>
    %c1 = arith.constant 1 : index
    %c0_8 = arith.constant 0 : index
    %c0_9 = arith.constant 0 : index
    %13 = vector.load %arg1[%c1, %c0_8, %c0_9] : memref<3x16x128xf32, #tpu.memory_space<vmem>>, vector<1x16x128xf32>
    %14 = vector.shape_cast %13 : vector<1x16x128xf32> to vector<16x128xf32>
    %c1_10 = arith.constant 1 : index
    %c0_11 = arith.constant 0 : index
    %c0_12 = arith.constant 0 : index
    %15 = vector.load %arg2[%c1_10, %c0_11, %c0_12] : memref<3x16x128xf32, #tpu.memory_space<vmem>>, vector<1x16x128xf32>
    %16 = vector.shape_cast %15 : vector<1x16x128xf32> to vector<16x128xf32>
    %17 = arith.subf %14, %16 : vector<16x128xf32>
    %18 = math.absf %17 : vector<16x128xf32>
    %cst_13 = arith.constant 2.44140625E-4 : f32
    %19 = vector.broadcast %cst_13 : f32 to vector<16x128xf32>
    %20 = arith.mulf %19, %18 : vector<16x128xf32>
    %21 = arith.addf %12, %20 : vector<16x128xf32>
    %c2 = arith.constant 2 : index
    %c0_14 = arith.constant 0 : index
    %c0_15 = arith.constant 0 : index
    %22 = vector.load %arg1[%c2, %c0_14, %c0_15] : memref<3x16x128xf32, #tpu.memory_space<vmem>>, vector<1x16x128xf32>
    %23 = vector.shape_cast %22 : vector<1x16x128xf32> to vector<16x128xf32>
    %c2_16 = arith.constant 2 : index
    %c0_17 = arith.constant 0 : index
    %c0_18 = arith.constant 0 : index
    %24 = vector.load %arg2[%c2_16, %c0_17, %c0_18] : memref<3x16x128xf32, #tpu.memory_space<vmem>>, vector<1x16x128xf32>
    %25 = vector.shape_cast %24 : vector<1x16x128xf32> to vector<16x128xf32>
    %cst_19 = arith.constant 0.000000e+00 : f32
    %26 = vector.broadcast %cst_19 : f32 to vector<16x128xf32>
    %27 = arith.maximumf %23, %26 : vector<16x128xf32>
    %28 = arith.mulf %23, %25 : vector<16x128xf32>
    %29 = arith.subf %27, %28 : vector<16x128xf32>
    %30 = math.absf %23 : vector<16x128xf32>
    %cst_20 = arith.constant 0.000000e+00 : f32
    %31 = vector.broadcast %cst_20 : f32 to vector<16x128xf32>
    %32 = arith.subf %31, %30 : vector<16x128xf32>
    %33 = math.exp %32 : vector<16x128xf32>
    %34 = math.log1p %33 : vector<16x128xf32>
    %35 = arith.addf %29, %34 : vector<16x128xf32>
    %cst_21 = arith.constant 9.765625E-4 : f32
    %36 = vector.broadcast %cst_21 : f32 to vector<16x128xf32>
    %37 = arith.mulf %36, %35 : vector<16x128xf32>
    %38 = arith.addf %21, %37 : vector<16x128xf32>
    %c0_22 = arith.constant 0 : index
    %c0_23 = arith.constant 0 : index
    %39 = vector.load %arg4[%c0_22, %c0_23] : memref<16x128xf32, #tpu.memory_space<vmem>>, vector<16x128xf32>
    tpu.vector_store %arg4[%c0_22, %c0_23], %38 {strides = array<i32>} : memref<16x128xf32, #tpu.memory_space<vmem>>, vector<16x128xf32>,
    %c0_i32_24 = arith.constant 0 : i32
    %40 = arith.cmpi eq, %arg0, %c0_i32_24 : i32
    %41 = arith.extui %40 : i1 to i32
    %c0_i32_25 = arith.constant 0 : i32
    %42 = arith.cmpi ne, %41, %c0_i32_25 : i32
    scf.if %42 {
      %c0_26 = arith.constant 0 : index
      %c0_27 = arith.constant 0 : index
      %43 = vector.load %arg4[%c0_26, %c0_27] : memref<16x128xf32, #tpu.memory_space<vmem>>, vector<16x128xf32>
      %44 = vector.shape_cast %43 : vector<16x128xf32> to vector<1x16x128xf32>
      %cst_28 = arith.constant dense<0.000000e+00> : vector<1xf32>
      %45 = vector.multi_reduction <add>, %44, %cst_28 [1, 2] : vector<1x16x128xf32> to vector<1xf32>
      %46 = vector.shape_cast %45 : vector<1xf32> to vector<1x1x1xf32>
      %47 = vector.extract %46[0, 0, 0] : f32 from vector<1x1x1xf32>
      %c0_29 = arith.constant 0 : index
      %c0_30 = arith.constant 0 : index
      %48 = memref.load %arg3[%c0_29, %c0_30] : memref<1x1xf32, #tpu.memory_space<smem>>
      memref.store %47, %arg3[%c0_29, %c0_30] : memref<1x1xf32, #tpu.memory_space<smem>>
    } else {
    }
    return
  }
  func.func @transform_0(%arg0: i32) -> (i32, i32, i32) {
    %c0_i32 = arith.constant 0 : i32
    %c0_i32_0 = arith.constant 0 : i32
    %c0_i32_1 = arith.constant 0 : i32
    return %c0_i32, %arg0, %c0_i32_0 : i32, i32, i32
  }
  func.func @transform_1(%arg0: i32) -> (i32, i32, i32) {
    %c0_i32 = arith.constant 0 : i32
    %c0_i32_0 = arith.constant 0 : i32
    %c0_i32_1 = arith.constant 0 : i32
    return %c0_i32, %arg0, %c0_i32_0 : i32, i32, i32
  }
  func.func @transform_2(%arg0: i32) -> (i32, i32) {
    %c0_i32 = arith.constant 0 : i32
    %c0_i32_0 = arith.constant 0 : i32
    %c0_i32_1 = arith.constant 0 : i32
    return %c0_i32, %c0_i32_0 : i32, i32
  }
}

</mosaic_0001>

<bundles_post_ra>
// kernel: merged_loss.1
= control target key start
LH: loop header
LB: loop body
LE: loop exit
PB: predicated region body
PF: predicated region fallthrough
CT: control target
= control target key end

     0   :  { %s217_s0 = inlined_call_operand.vmem [shape: f32[3,16,128], index: 0, kind: input, shape index: {}]   ;;  %s218_s1 = inlined_call_operand.vmem [shape: f32[3,16,128], index: 1, kind: input, shape index: {}]   ;;  %s219_s2 = inlined_call_operand.hbm [shape: f32[1,1], index: 2, kind: output, shape index: {}]  }
   0x1   :  { %v126_v0 = vld [vmem:[%s217_s0 + $0x20] sm:$0xff]  ;;  %v127_v1 = vld [vmem:[%s217_s0 + $0x28] sm:$0xff] }
   0x2   :  { %7 = vsyncpa [#allocation4], 0  ;;  %v58_v2 = vand.u32 2147483647, %v126_v0  ;;  %v59_v3 = vand.u32 2147483647, %v127_v1 }
   0x3   :  { %v20_v9 = vld [vmem:[%s217_s0] sm:$0xff]  ;;  %v21_v11 = vld [vmem:[%s217_s0 + $0x8] sm:$0xff]  ;;  %v122_v15 = vld [vmem:[%s217_s0 + $0x10] sm:$0xff]  ;;  %v52_v30 = vmax.f32 %v126_v0, 0.0  ;;  %v53_v37 = vmax.f32 %v127_v1, 0.0  ;;  %s141_s6 = scalar_lea.hbm %s219_s2, 16 }
   0x4   :  { %v60_v4 = vsub.f32 0.0, %v58_v2  ;;  %v61_v5 = vsub.f32 0.0, %v59_v3  ;;  %v22_v12 = vld [vmem:[%s218_s1] sm:$0xff]  ;;  %v23_v13 = vld [vmem:[%s218_s1 + $0x8] sm:$0xff]  ;;  %v124_v16 = vld [vmem:[%s218_s1 + $0x10] sm:$0xff]  ;;  %p142_p0 = scmp.ne.s32.totalorder %s219_s2, %s141_s6  ;;  %p145_p1 = scmp.lt.u32.totalorder %s141_s6, %s219_s2 }
   0x5   :  { %v123_v18 = vld [vmem:[%s217_s0 + $0x18] sm:$0xff]  ;;  %v24_v20 = vsub.f32 %v20_v9, %v22_v12  ;;  %v25_v21 = vsub.f32 %v21_v11, %v23_v13  ;;  %v38_v23 = vsub.f32 %v122_v15, %v124_v16  ;;  %v128_v26 = vld [vmem:[%s218_s1 + $0x20] sm:$0xff]  ;;  %v129_v27 = vld [vmem:[%s218_s1 + $0x28] sm:$0xff] }
   0x6   :  { %v62_v6 = vmul.f32 1.442695, %v60_v4  ;;  %v64_v7 = vmul.f32 1.442695, %v61_v5  ;;  %v125_v19 = vld [vmem:[%s218_s1 + $0x18] sm:$0xff]  ;;  %v54_v33 = vmul.f32 %v128_v26, %v126_v0  ;;  %v55_v38 = vmul.f32 %v129_v27, %v127_v1  ;;  %p147_p2 = pnand %p145_p1, %p142_p0 }
   0x7   :  { %v39_v25 = vsub.f32 %v123_v18, %v125_v19  ;;  %v26_v28 = vmul.f32 %v24_v20, %v24_v20  ;;  %v27_v29 = vmul.f32 %v25_v21, %v25_v21  ;;  %v40_v32 = vand.u32 2147483647, %v38_v23 }
   0x8   :  { %133 = vpow2.f32 %v62_v6  ;;  %v56_v45 = vsub.f32 %v52_v30, %v54_v33  ;;  %v57_v49 = vsub.f32 %v53_v37, %v55_v38 }
   0x9   :  { %135 = vpow2.f32 %v64_v7  ;;  %v41_v36 = vand.u32 2147483647, %v39_v25  ;;  %v28_v40 = vmul.f32 0.00048828125, %v26_v28  ;;  %v29_v41 = vmul.f32 0.00048828125, %v27_v29 }
   0xa   :  { %v42_v44 = vmul.f32 0.00024414063, %v40_v32 }
   0xb   :  { %v43_v48 = vmul.f32 0.00024414063, %v41_v36 }
   0xc   :  { %v44_v53 = vadd.f32 %v42_v44, %v28_v40 }
   0xd   :  { %v45_v56 = vadd.f32 %v43_v48, %v29_v41 }
  0x12   :  { %v134_v8 = vpop.eup %133 }
  0x13   :  { %v136_v10 = vpop.eup %135  ;;  %v66_v14 = vadd.f32 1.0, %v134_v8  ;;  %v69_v22 = vmul.f32 -0.5, %v134_v8  ;;  %v72_v34 = vand.u32 2147483647, %v134_v8 }
  0x14   :  { %v75_v17 = vadd.f32 1.0, %v136_v10  ;;  %v78_v24 = vmul.f32 -0.5, %v136_v10  ;;  %v81_v39 = vand.u32 2147483647, %v136_v10 }
  0x15   :  { %137 = vlog2.f32 %v66_v14  ;;  %v70_v31 = vadd.f32 1.0, %v69_v22  ;;  %vm73_vm0 = vcmp.lt.f32.partialorder %v72_v34, 0.0004427343 }
  0x16   :  { %139 = vlog2.f32 %v75_v17  ;;  %v79_v35 = vadd.f32 1.0, %v78_v24  ;;  %vm82_vm1 = vcmp.lt.f32.partialorder %v81_v39, 0.0004427343 }
  0x17   :  { %v71_v42 = vmul.f32 %v134_v8, %v70_v31 }
  0x18   :  { %v80_v46 = vmul.f32 %v136_v10, %v79_v35 }
  0x1f   :  { %v138_v43 = vpop.eup %137 }
  0x20   :  { %v140_v47 = vpop.eup %139  ;;  %v68_v50 = vmul.f32 0.6931472, %v138_v43 }
  0x21   :  { %v77_v51 = vmul.f32 0.6931472, %v140_v47 }
  0x22   :  { %v74_v52 = vsel %vm73_vm0, %v71_v42, %v68_v50 }
  0x23   :  { %v83_v54 = vsel %vm82_vm1, %v80_v46, %v77_v51  ;;  %v84_v55 = vadd.f32 %v74_v52, %v56_v45 }
  0x24   :  { %v85_v57 = vadd.f32 %v83_v54, %v57_v49 }
  0x25   :  { %v86_v58 = vmul.f32 0.0009765625, %v84_v55 }
  0x26   :  { %v87_v59 = vmul.f32 0.0009765625, %v85_v57 }
  0x27   :  { %v88_v60 = vadd.f32 %v86_v58, %v44_v53 }
  0x28   :  { %v89_v61 = vadd.f32 %v87_v59, %v45_v56 }
  0x2a   :  { %v97_v62 = vadd.f32 %v89_v61, %v88_v60 }
  0x2c   :  { %98 = vadd.xlane.f32.xlu0 %v97_v62 }
  0xb9   :  { %v99_v63 = vpop.xlane.xlu0 %98 }
  0xba   :  { %v100_v0 = vrot.slane %v99_v63, 4 }
  0xbc   :  { %v101_v1 = vadd.f32 %v100_v0, %v99_v63 }
  0xbe   :  { %v102_v2 = vrot.slane %v101_v1, 2 }
  0xc0   :  { %v103_v3 = vadd.f32 %v102_v2, %v101_v1 }
  0xc2   :  { %v104_v4 = vrot.slane %v103_v3, 1 }
  0xc4   :  { %v105_v5 = vadd.f32 %v104_v4, %v103_v3 }
  0xc6   :  { %130 = vpush %v105_v5 }
  0xf7   :  { %s131_s0 = spop %130 }
  0xf8   :  { %108 = sst [smem:[#allocation3]] %s131_s0 }
  0xf9   :  { %150 = shalt.err (!%p147_p2)
}
  0xfa   :  { %s153_s11 = smov [#allocation3]  }
  0xfb   :  { %116 = dma.smem_to_hbm %s153_s11, 16, %s219_s2, [#allocation4]  }
  0xfc   :  { %151 = dma.done.wait [#allocation4], 16  }
  0xfd   :  { %152 = vsyncadd [#allocation4], 4294967280 }
  0xfe   :  { %120 = sfence }
  0xff   :  { %121 = vsyncpa [#allocation4], 1 }

</bundles_post_ra>
